<compile_context>
chip_gen: v5e
topology: v5e:2x2
jax: 0.10.0
libtpu: 0.0.40
codegen_flags: <defaults>
</compile_context>

<pallas_src>
import numpy as np
import jax
import jax.numpy as jnp
from jax.experimental import pallas as pl
from jax.experimental.pallas import tpu as pltpu


_MIN_LANES = 128                       # pad tiny W up to one full lane tile
_VMEM_LIMIT_BYTES = 48 * 1024 * 1024   # fits v5e/v6e (128 MiB) and v7x (64 MiB)


def _centered_dft_matrix(n: int) -> np.ndarray:
    """Complex M such that M @ v == fftshift(fft(ifftshift(v), norm='ortho')).

    Built by pushing the identity through numpy's ifftshift/fft/fftshift, so
    the shift folding is exact for both even and odd n.
    """
    eye = np.eye(n)
    return np.fft.fftshift(
        np.fft.fft(np.fft.ifftshift(eye, axes=0), axis=0, norm="ortho"),
        axes=0)


def _fft2c_kernel(ar_ref, ai_ref, as_ref, btr_ref, bti_ref, bts_ref,
                  x_ref, o_ref, tr_ref, ti_ref):
    """Fused centered 2D DFT of one (2, H, Wp) image block.

    Stage 1 (W-transform, right-multiply): T = X @ B^T   (contraction over W)
    Stage 2 (H-transform, left-multiply):  K = A @ T     (contraction over H)
    Both complex products use the 3-matmul Karatsuba form; the combines are
    done in place so at most one matmul temporary is live at a time.
    """
    xr = x_ref[0, 0]          # (H, Wp) real part
    xi = x_ref[0, 1]          # (H, Wp) imag part

    # ---- Stage 1: T = X @ B^T ----------------------------------------------
    ti_ref[...] = jnp.dot(xr + xi, bts_ref[...],
                          preferred_element_type=jnp.float32)       # t3
    t1 = jnp.dot(xr, btr_ref[...], preferred_element_type=jnp.float32)
    tr_ref[...] = t1
    ti_ref[...] -= t1
    t2 = jnp.dot(xi, bti_ref[...], preferred_element_type=jnp.float32)
    tr_ref[...] -= t2          # real: xr@Btr - xi@Bti
    ti_ref[...] -= t2          # imag: xr@Bti + xi@Btr

    # ---- Stage 2: K = A @ T -------------------------------------------------
    trv = tr_ref[...]
    tiv = ti_ref[...]
    o_ref[0, 1] = jnp.dot(as_ref[...], trv + tiv,
                          preferred_element_type=jnp.float32)       # u3
    u1 = jnp.dot(ar_ref[...], trv, preferred_element_type=jnp.float32)
    o_ref[0, 0] = u1
    o_ref[0, 1] -= u1
    u2 = jnp.dot(ai_ref[...], tiv, preferred_element_type=jnp.float32)
    o_ref[0, 0] -= u2          # real: ar@Tr - ai@Ti
    o_ref[0, 1] -= u2          # imag: ar@Ti + ai@Tr


def fft_forward(x):
    """Equivalent of FFT.forward for x of shape (B, 2, H, W)."""
    B, C, H, W = x.shape
    assert C == 2, "FFT module expects 2 channels (real, imag)"
    x = x.astype(jnp.float32)

    # Lane-density: pad W up to one full 128-lane tile when it is small.
    Wp = W if W >= _MIN_LANES else _MIN_LANES

    # Constant centered-DFT matrices (host numpy; constants under jit).
    a = _centered_dft_matrix(H)          # left  (H-axis) transform, (H, H)
    bt = _centered_dft_matrix(W).T       # right (W-axis) transform, transposed
    ar = np.asarray(a.real, np.float32)
    ai = np.asarray(a.imag, np.float32)
    asum = ar + ai
    btr = np.zeros((Wp, Wp), np.float32)
    bti = np.zeros((Wp, Wp), np.float32)
    btr[:W, :W] = bt.real
    bti[:W, :W] = bt.imag
    btsum = btr + bti

    if Wp != W:
        x = jnp.pad(x, ((0, 0), (0, 0), (0, 0), (0, Wp - W)))

    # Constant matrices: whole-array VMEM placement -> single buffered, copied
    # in once per call (never re-DMA'd or double-buffered across grid steps).
    mat_spec = pl.BlockSpec(memory_space=pltpu.MemorySpace.VMEM)
    # One image (both channels) per grid step, lane-dense blocks.
    img_spec = pl.BlockSpec((1, 2, H, Wp), lambda b: (b, 0, 0, 0))

    out = pl.pallas_call(
        _fft2c_kernel,
        out_shape=jax.ShapeDtypeStruct((B, 2, H, Wp), jnp.float32),
        grid_spec=pltpu.PrefetchScalarGridSpec(
            num_scalar_prefetch=0,
            grid=(B,),                 # B >= 2 shards across v7x's two cores
            in_specs=[mat_spec] * 6 + [img_spec],
            out_specs=img_spec,
            scratch_shapes=[pltpu.VMEM((H, Wp), jnp.float32),
                            pltpu.VMEM((H, Wp), jnp.float32)],
        ),
        compiler_params=pltpu.CompilerParams(
            dimension_semantics=("parallel",),
            vmem_limit_bytes=_VMEM_LIMIT_BYTES),
    )(jnp.asarray(ar), jnp.asarray(ai), jnp.asarray(asum),
      jnp.asarray(btr), jnp.asarray(bti), jnp.asarray(btsum), x)

    if Wp != W:
        out = out[..., :W]
    return out


if __name__ == "__main__":
    B, C, H, W = 2, 2, 16, 16
    key = jax.random.PRNGKey(0)
    x = jax.random.normal(key, (B, C, H, W), dtype=jnp.float32)

    fn = jax.jit(fft_forward)
    out = jax.block_until_ready(fn(x))

    # Reference: centered, orthonormal 2D FFT (fastmri.fft2c semantics).
    xc = x[:, 0] + 1j * x[:, 1]
    kc = jnp.fft.fftshift(
        jnp.fft.fft2(jnp.fft.ifftshift(xc, axes=(-2, -1)),
                     axes=(-2, -1), norm="ortho"),
        axes=(-2, -1))
    ref = jnp.stack([kc.real, kc.imag], axis=1)

    np.testing.assert_allclose(np.asarray(out), np.asarray(ref),
                               rtol=1e-4, atol=1e-4)
    print("KERNEL_OK")
</pallas_src>

<mosaic_0001>
module attributes {stable_mosaic.version = 11 : i64} {
  func.func @_fft2c_kernel(%arg0: i32, %arg1: memref<16x16xf32, #tpu.memory_space<vmem>>, %arg2: memref<16x16xf32, #tpu.memory_space<vmem>>, %arg3: memref<16x16xf32, #tpu.memory_space<vmem>>, %arg4: memref<128x128xf32, #tpu.memory_space<vmem>>, %arg5: memref<128x128xf32, #tpu.memory_space<vmem>>, %arg6: memref<128x128xf32, #tpu.memory_space<vmem>>, %arg7: memref<1x2x16x128xf32, #tpu.memory_space<vmem>>, %arg8: memref<1x2x16x128xf32, #tpu.memory_space<vmem>>, %arg9: memref<16x128xf32, #tpu.memory_space<vmem>>, %arg10: memref<16x128xf32, #tpu.memory_space<vmem>>) attributes {dimension_semantics = [#tpu.dimension_semantics<parallel>], iteration_bounds = array<i64: 2>, scalar_prefetch = 0 : i64, scratch_operands = 2 : i64, tpu.core_type = #tpu.core_type<tc>, window_params = [{pipeline_mode = #tpu.pipeline_mode<synchronous>, transform_indices = @transform_0, window_bounds = array<i64: 16, 16>}, {pipeline_mode = #tpu.pipeline_mode<synchronous>, transform_indices = @transform_1, window_bounds = array<i64: 16, 16>}, {pipeline_mode = #tpu.pipeline_mode<synchronous>, transform_indices = @transform_2, window_bounds = array<i64: 16, 16>}, {pipeline_mode = #tpu.pipeline_mode<synchronous>, transform_indices = @transform_3, window_bounds = array<i64: 128, 128>}, {pipeline_mode = #tpu.pipeline_mode<synchronous>, transform_indices = @transform_4, window_bounds = array<i64: 128, 128>}, {pipeline_mode = #tpu.pipeline_mode<synchronous>, transform_indices = @transform_5, window_bounds = array<i64: 128, 128>}, {transform_indices = @transform_6, window_bounds = array<i64: 1, 2, 16, 128>}, {transform_indices = @transform_7, window_bounds = array<i64: 1, 2, 16, 128>}]} {
    %c0 = arith.constant 0 : index
    %c0_0 = arith.constant 0 : index
    %c0_1 = arith.constant 0 : index
    %c0_2 = arith.constant 0 : index
    %0 = vector.load %arg7[%c0, %c0_0, %c0_1, %c0_2] : memref<1x2x16x128xf32, #tpu.memory_space<vmem>>, vector<1x1x16x128xf32>
    %1 = vector.shape_cast %0 : vector<1x1x16x128xf32> to vector<16x128xf32>
    %c0_3 = arith.constant 0 : index
    %c1 = arith.constant 1 : index
    %c0_4 = arith.constant 0 : index
    %c0_5 = arith.constant 0 : index
    %2 = vector.load %arg7[%c0_3, %c1, %c0_4, %c0_5] : memref<1x2x16x128xf32, #tpu.memory_space<vmem>>, vector<1x1x16x128xf32>
    %3 = vector.shape_cast %2 : vector<1x1x16x128xf32> to vector<16x128xf32>
    %4 = arith.addf %1, %3 : vector<16x128xf32>
    %c0_6 = arith.constant 0 : index
    %c0_7 = arith.constant 0 : index
    %5 = vector.load %arg6[%c0_6, %c0_7] : memref<128x128xf32, #tpu.memory_space<vmem>>, vector<128x128xf32>
    %cst = arith.constant dense<0.000000e+00> : vector<16x128xf32>
    %6 = tpu.matmul %4, %5, %cst {dimension_numbers = #tpu.dot_dimension_numbers<[1], [0], [0], [1], [0, 0, 1, 1], [], []>} : vector<16x128xf32>, vector<128x128xf32>, vector<16x128xf32> -> vector<16x128xf32>
    %c0_8 = arith.constant 0 : index
    %c0_9 = arith.constant 0 : index
    %7 = vector.load %arg10[%c0_8, %c0_9] : memref<16x128xf32, #tpu.memory_space<vmem>>, vector<16x128xf32>
    tpu.vector_store %arg10[%c0_8, %c0_9], %6 {strides = array<i32>} : memref<16x128xf32, #tpu.memory_space<vmem>>, vector<16x128xf32>,
    %c0_10 = arith.constant 0 : index
    %c0_11 = arith.constant 0 : index
    %8 = vector.load %arg4[%c0_10, %c0_11] : memref<128x128xf32, #tpu.memory_space<vmem>>, vector<128x128xf32>
    %cst_12 = arith.constant dense<0.000000e+00> : vector<16x128xf32>
    %9 = tpu.matmul %1, %8, %cst_12 {dimension_numbers = #tpu.dot_dimension_numbers<[1], [0], [0], [1], [0, 0, 1, 1], [], []>} : vector<16x128xf32>, vector<128x128xf32>, vector<16x128xf32> -> vector<16x128xf32>
    %c0_13 = arith.constant 0 : index
    %c0_14 = arith.constant 0 : index
    %10 = vector.load %arg9[%c0_13, %c0_14] : memref<16x128xf32, #tpu.memory_space<vmem>>, vector<16x128xf32>
    tpu.vector_store %arg9[%c0_13, %c0_14], %9 {strides = array<i32>} : memref<16x128xf32, #tpu.memory_space<vmem>>, vector<16x128xf32>,
    %c0_15 = arith.constant 0 : index
    %c0_16 = arith.constant 0 : index
    %11 = vector.load %arg10[%c0_15, %c0_16] : memref<16x128xf32, #tpu.memory_space<vmem>>, vector<16x128xf32>
    %12 = arith.subf %11, %9 : vector<16x128xf32>
    %c0_17 = arith.constant 0 : index
    %c0_18 = arith.constant 0 : index
    %13 = vector.load %arg10[%c0_17, %c0_18] : memref<16x128xf32, #tpu.memory_space<vmem>>, vector<16x128xf32>
    tpu.vector_store %arg10[%c0_17, %c0_18], %12 {strides = array<i32>} : memref<16x128xf32, #tpu.memory_space<vmem>>, vector<16x128xf32>,
    %c0_19 = arith.constant 0 : index
    %c0_20 = arith.constant 0 : index
    %14 = vector.load %arg5[%c0_19, %c0_20] : memref<128x128xf32, #tpu.memory_space<vmem>>, vector<128x128xf32>
    %cst_21 = arith.constant dense<0.000000e+00> : vector<16x128xf32>
    %15 = tpu.matmul %3, %14, %cst_21 {dimension_numbers = #tpu.dot_dimension_numbers<[1], [0], [0], [1], [0, 0, 1, 1], [], []>} : vector<16x128xf32>, vector<128x128xf32>, vector<16x128xf32> -> vector<16x128xf32>
    %c0_22 = arith.constant 0 : index
    %c0_23 = arith.constant 0 : index
    %16 = vector.load %arg9[%c0_22, %c0_23] : memref<16x128xf32, #tpu.memory_space<vmem>>, vector<16x128xf32>
    %17 = arith.subf %16, %15 : vector<16x128xf32>
    %c0_24 = arith.constant 0 : index
    %c0_25 = arith.constant 0 : index
    %18 = vector.load %arg9[%c0_24, %c0_25] : memref<16x128xf32, #tpu.memory_space<vmem>>, vector<16x128xf32>
    tpu.vector_store %arg9[%c0_24, %c0_25], %17 {strides = array<i32>} : memref<16x128xf32, #tpu.memory_space<vmem>>, vector<16x128xf32>,
    %c0_26 = arith.constant 0 : index
    %c0_27 = arith.constant 0 : index
    %19 = vector.load %arg10[%c0_26, %c0_27] : memref<16x128xf32, #tpu.memory_space<vmem>>, vector<16x128xf32>
    %20 = arith.subf %19, %15 : vector<16x128xf32>
    %c0_28 = arith.constant 0 : index
    %c0_29 = arith.constant 0 : index
    %21 = vector.load %arg10[%c0_28, %c0_29] : memref<16x128xf32, #tpu.memory_space<vmem>>, vector<16x128xf32>
    tpu.vector_store %arg10[%c0_28, %c0_29], %20 {strides = array<i32>} : memref<16x128xf32, #tpu.memory_space<vmem>>, vector<16x128xf32>,
    %c0_30 = arith.constant 0 : index
    %c0_31 = arith.constant 0 : index
    %22 = vector.load %arg9[%c0_30, %c0_31] : memref<16x128xf32, #tpu.memory_space<vmem>>, vector<16x128xf32>
    %c0_32 = arith.constant 0 : index
    %c0_33 = arith.constant 0 : index
    %23 = vector.load %arg10[%c0_32, %c0_33] : memref<16x128xf32, #tpu.memory_space<vmem>>, vector<16x128xf32>
    %c0_34 = arith.constant 0 : index
    %c0_35 = arith.constant 0 : index
    %24 = vector.load %arg3[%c0_34, %c0_35] : memref<16x16xf32, #tpu.memory_space<vmem>>, vector<16x16xf32>
    %25 = arith.addf %22, %23 : vector<16x128xf32>
    %cst_36 = arith.constant dense<0.000000e+00> : vector<16x128xf32>
    %26 = tpu.matmul %24, %25, %cst_36 {dimension_numbers = #tpu.dot_dimension_numbers<[1], [0], [0], [1], [0, 0, 1, 1], [], []>} : vector<16x16xf32>, vector<16x128xf32>, vector<16x128xf32> -> vector<16x128xf32>
    %c0_37 = arith.constant 0 : index
    %c1_38 = arith.constant 1 : index
    %c0_39 = arith.constant 0 : index
    %c0_40 = arith.constant 0 : index
    %27 = vector.load %arg8[%c0_37, %c1_38, %c0_39, %c0_40] : memref<1x2x16x128xf32, #tpu.memory_space<vmem>>, vector<1x1x16x128xf32>
    %28 = vector.shape_cast %27 : vector<1x1x16x128xf32> to vector<16x128xf32>
    %29 = vector.shape_cast %26 : vector<16x128xf32> to vector<1x1x16x128xf32>
    tpu.vector_store %arg8[%c0_37, %c1_38, %c0_39, %c0_40], %29 {strides = array<i32>} : memref<1x2x16x128xf32, #tpu.memory_space<vmem>>, vector<1x1x16x128xf32>,
    %c0_41 = arith.constant 0 : index
    %c0_42 = arith.constant 0 : index
    %30 = vector.load %arg1[%c0_41, %c0_42] : memref<16x16xf32, #tpu.memory_space<vmem>>, vector<16x16xf32>
    %cst_43 = arith.constant dense<0.000000e+00> : vector<16x128xf32>
    %31 = tpu.matmul %30, %22, %cst_43 {dimension_numbers = #tpu.dot_dimension_numbers<[1], [0], [0], [1], [0, 0, 1, 1], [], []>} : vector<16x16xf32>, vector<16x128xf32>, vector<16x128xf32> -> vector<16x128xf32>
    %c0_44 = arith.constant 0 : index
    %c0_45 = arith.constant 0 : index
    %c0_46 = arith.constant 0 : index
    %c0_47 = arith.constant 0 : index
    %32 = vector.load %arg8[%c0_44, %c0_45, %c0_46, %c0_47] : memref<1x2x16x128xf32, #tpu.memory_space<vmem>>, vector<1x1x16x128xf32>
    %33 = vector.shape_cast %32 : vector<1x1x16x128xf32> to vector<16x128xf32>
    %34 = vector.shape_cast %31 : vector<16x128xf32> to vector<1x1x16x128xf32>
    tpu.vector_store %arg8[%c0_44, %c0_45, %c0_46, %c0_47], %34 {strides = array<i32>} : memref<1x2x16x128xf32, #tpu.memory_space<vmem>>, vector<1x1x16x128xf32>,
    %c0_48 = arith.constant 0 : index
    %c1_49 = arith.constant 1 : index
    %c0_50 = arith.constant 0 : index
    %c0_51 = arith.constant 0 : index
    %35 = vector.load %arg8[%c0_48, %c1_49, %c0_50, %c0_51] : memref<1x2x16x128xf32, #tpu.memory_space<vmem>>, vector<1x1x16x128xf32>
    %36 = vector.shape_cast %35 : vector<1x1x16x128xf32> to vector<16x128xf32>
    %37 = arith.subf %36, %31 : vector<16x128xf32>
    %c0_52 = arith.constant 0 : index
    %c1_53 = arith.constant 1 : index
    %c0_54 = arith.constant 0 : index
    %c0_55 = arith.constant 0 : index
    %38 = vector.load %arg8[%c0_52, %c1_53, %c0_54, %c0_55] : memref<1x2x16x128xf32, #tpu.memory_space<vmem>>, vector<1x1x16x128xf32>
    %39 = vector.shape_cast %38 : vector<1x1x16x128xf32> to vector<16x128xf32>
    %40 = vector.shape_cast %37 : vector<16x128xf32> to vector<1x1x16x128xf32>
    tpu.vector_store %arg8[%c0_52, %c1_53, %c0_54, %c0_55], %40 {strides = array<i32>} : memref<1x2x16x128xf32, #tpu.memory_space<vmem>>, vector<1x1x16x128xf32>,
    %c0_56 = arith.constant 0 : index
    %c0_57 = arith.constant 0 : index
    %41 = vector.load %arg2[%c0_56, %c0_57] : memref<16x16xf32, #tpu.memory_space<vmem>>, vector<16x16xf32>
    %cst_58 = arith.constant dense<0.000000e+00> : vector<16x128xf32>
    %42 = tpu.matmul %41, %23, %cst_58 {dimension_numbers = #tpu.dot_dimension_numbers<[1], [0], [0], [1], [0, 0, 1, 1], [], []>} : vector<16x16xf32>, vector<16x128xf32>, vector<16x128xf32> -> vector<16x128xf32>
    %c0_59 = arith.constant 0 : index
    %c0_60 = arith.constant 0 : index
    %c0_61 = arith.constant 0 : index
    %c0_62 = arith.constant 0 : index
    %43 = vector.load %arg8[%c0_59, %c0_60, %c0_61, %c0_62] : memref<1x2x16x128xf32, #tpu.memory_space<vmem>>, vector<1x1x16x128xf32>
    %44 = vector.shape_cast %43 : vector<1x1x16x128xf32> to vector<16x128xf32>
    %45 = arith.subf %44, %42 : vector<16x128xf32>
    %c0_63 = arith.constant 0 : index
    %c0_64 = arith.constant 0 : index
    %c0_65 = arith.constant 0 : index
    %c0_66 = arith.constant 0 : index
    %46 = vector.load %arg8[%c0_63, %c0_64, %c0_65, %c0_66] : memref<1x2x16x128xf32, #tpu.memory_space<vmem>>, vector<1x1x16x128xf32>
    %47 = vector.shape_cast %46 : vector<1x1x16x128xf32> to vector<16x128xf32>
    %48 = vector.shape_cast %45 : vector<16x128xf32> to vector<1x1x16x128xf32>
    tpu.vector_store %arg8[%c0_63, %c0_64, %c0_65, %c0_66], %48 {strides = array<i32>} : memref<1x2x16x128xf32, #tpu.memory_space<vmem>>, vector<1x1x16x128xf32>,
    %c0_67 = arith.constant 0 : index
    %c1_68 = arith.constant 1 : index
    %c0_69 = arith.constant 0 : index
    %c0_70 = arith.constant 0 : index
    %49 = vector.load %arg8[%c0_67, %c1_68, %c0_69, %c0_70] : memref<1x2x16x128xf32, #tpu.memory_space<vmem>>, vector<1x1x16x128xf32>
    %50 = vector.shape_cast %49 : vector<1x1x16x128xf32> to vector<16x128xf32>
    %51 = arith.subf %50, %42 : vector<16x128xf32>
    %c0_71 = arith.constant 0 : index
    %c1_72 = arith.constant 1 : index
    %c0_73 = arith.constant 0 : index
    %c0_74 = arith.constant 0 : index
    %52 = vector.load %arg8[%c0_71, %c1_72, %c0_73, %c0_74] : memref<1x2x16x128xf32, #tpu.memory_space<vmem>>, vector<1x1x16x128xf32>
    %53 = vector.shape_cast %52 : vector<1x1x16x128xf32> to vector<16x128xf32>
    %54 = vector.shape_cast %51 : vector<16x128xf32> to vector<1x1x16x128xf32>
    tpu.vector_store %arg8[%c0_71, %c1_72, %c0_73, %c0_74], %54 {strides = array<i32>} : memref<1x2x16x128xf32, #tpu.memory_space<vmem>>, vector<1x1x16x128xf32>,
    return
  }
  func.func @transform_0(%arg0: i32) -> (i32, i32) {
    %c0_i32 = arith.constant 0 : i32
    %c0_i32_0 = arith.constant 0 : i32
    %c0_i32_1 = arith.constant 0 : i32
    return %c0_i32, %c0_i32_0 : i32, i32
  }
  func.func @transform_1(%arg0: i32) -> (i32, i32) {
    %c0_i32 = arith.constant 0 : i32
    %c0_i32_0 = arith.constant 0 : i32
    %c0_i32_1 = arith.constant 0 : i32
    return %c0_i32, %c0_i32_0 : i32, i32
  }
  func.func @transform_2(%arg0: i32) -> (i32, i32) {
    %c0_i32 = arith.constant 0 : i32
    %c0_i32_0 = arith.constant 0 : i32
    %c0_i32_1 = arith.constant 0 : i32
    return %c0_i32, %c0_i32_0 : i32, i32
  }
  func.func @transform_3(%arg0: i32) -> (i32, i32) {
    %c0_i32 = arith.constant 0 : i32
    %c0_i32_0 = arith.constant 0 : i32
    %c0_i32_1 = arith.constant 0 : i32
    return %c0_i32, %c0_i32_0 : i32, i32
  }
  func.func @transform_4(%arg0: i32) -> (i32, i32) {
    %c0_i32 = arith.constant 0 : i32
    %c0_i32_0 = arith.constant 0 : i32
    %c0_i32_1 = arith.constant 0 : i32
    return %c0_i32, %c0_i32_0 : i32, i32
  }
  func.func @transform_5(%arg0: i32) -> (i32, i32) {
    %c0_i32 = arith.constant 0 : i32
    %c0_i32_0 = arith.constant 0 : i32
    %c0_i32_1 = arith.constant 0 : i32
    return %c0_i32, %c0_i32_0 : i32, i32
  }
  func.func @transform_6(%arg0: i32) -> (i32, i32, i32, i32) {
    %c0_i32 = arith.constant 0 : i32
    %c0_i32_0 = arith.constant 0 : i32
    %c0_i32_1 = arith.constant 0 : i32
    %c0_i32_2 = arith.constant 0 : i32
    return %arg0, %c0_i32, %c0_i32_0, %c0_i32_1 : i32, i32, i32, i32
  }
  func.func @transform_7(%arg0: i32) -> (i32, i32, i32, i32) {
    %c0_i32 = arith.constant 0 : i32
    %c0_i32_0 = arith.constant 0 : i32
    %c0_i32_1 = arith.constant 0 : i32
    %c0_i32_2 = arith.constant 0 : i32
    return %arg0, %c0_i32, %c0_i32_0, %c0_i32_1 : i32, i32, i32, i32
  }
}

</mosaic_0001>

<bundles_post_ra>
// kernel: fft_forward.1
= control target key start
LH: loop header
LB: loop body
LE: loop exit
PB: predicated region body
PF: predicated region fallthrough
CT: control target
= control target key end

     0   :  { %s1359_s0 = inlined_call_operand.hbm [shape: f32[16,16], index: 0, kind: input, shape index: {}]   ;;  %s1360_s1 = inlined_call_operand.hbm [shape: f32[16,16], index: 1, kind: input, shape index: {}]   ;;  %s1361_s2 = inlined_call_operand.hbm [shape: f32[16,16], index: 2, kind: input, shape index: {}]   ;;  %s1362_s3 = inlined_call_operand.hbm [shape: f32[128,128], index: 3, kind: input, shape index: {}]   ;;  %s1363_s4 = inlined_call_operand.hbm [shape: f32[128,128], index: 4, kind: input, shape index: {}]   ;;  %s1364_s5 = inlined_call_operand.vmem [shape: f32[128,128], index: 5, kind: input, shape index: {}]   ;;  %s1365_s6 = inlined_call_operand.vmem [shape: f32[2,2,16,128], index: 6, kind: input, shape index: {}]   ;;  %s1366_s7 = inlined_call_operand.hbm [shape: f32[2,2,16,128], index: 7, kind: output, shape index: {}]  }
   0x1   :  { %1367 = sst [smem:[#allocation19_spill]] %s1360_s1 }
   0x2   :  { %1368 = sst [smem:[#allocation20_spill]] %s1362_s3 }
   0x3   :  { %12 = vsyncpa [#allocation5], 0 }
   0x4   :  { %13 = vsyncpa [#allocation8], 0 }
   0x5   :  { %14 = vsyncpa [#allocation11], 0 }
   0x6   :  { %15 = vsyncpa [#allocation6], 0 }
   0x7   :  { %17 = vsyncpa [#allocation6 + $0x1], 0  ;;  %s1168_s24 = smov 0   ;;  %s1170_s25 = smov 0  }
   0x8   :  { %s1172_s26 = smov 0   ;;  %s1174_s27 = smov 0  }
   0x9 LB: > { %s1189_s28 = sadd.s32 4294967295, %s1117_s27   ;;  %s757_s29 = sadd.s32 4294967294, %s1117_s27   ;;  %s1117_s27 = sphi %s1174_s27, %s1380_s27   ;;  %s1113_s26 = sphi %s1172_s26, %s1379_s26   ;;  %s1109_s25 = sphi %s1170_s25, %s1378_s25   ;;  %s1105_s24 = sphi %s1168_s24, %s1377_s24  }
   0xa   : > { %s1193_s30 = sadd.s32 1, %s1117_s27   ;;  %s182_s8 = sadd.s32 1, %s1113_s26 }
   0xb   : > { %s179_s9 = ssub.s32 %s1117_s27, %s1193_s30  ;;  %p192_p0 = scmp.ne.s32.totalorder %s1113_s26, %s1109_s25 }
   0xc   : > { %p180_p1 = scmp.eq.s32.totalorder %s179_s9, 0  ;;  %p193_p2 = scmp.eq.s32.totalorder %s1189_s28, 1 }
   0xd   : > { %p198_p3 = scmp.ne.s32.totalorder %s1109_s25, %s1105_s24  ;;  %p199_p4 = scmp.eq.s32.totalorder %s757_s29, 1 }
   0xe   : > { %s1204_s10 = scalar_select %p180_p1, %s1113_s26, %s182_s8  }
   0xf   : > { %p1206_p5 = por %p193_p2, %p192_p0  ;;  %p1210_p6 = por %p199_p4, %p198_p3 }
  0x10   : > { %1369 = sst [smem:[#allocation18_spill]] %s1204_s10  ;;  %p758_p7 = scmp.ge.s32.totalorder %s1117_s27, 1 }
  0x11   : > { %p206_p8 = scmp.lt.s32.totalorder %s1117_s27, 3  ;;  %p841_p9 = scmp.eq.s32.totalorder %s1189_s28, 0 }
  0x12   : > { %s1373_s1 = sld [smem:[#allocation19_spill]]  ;;  %s1119_s21 = smov [#allocation7]  }
  0x13   : > { %p1217_p10 = pnand %p758_p7, %p206_p8  ;;  %s1374_s3 = sld [smem:[#allocation20_spill]] }
  0x14   : > { %s233_s22 = sshll.u32 %s1119_s21, 4  ;;  %s1120_s23 = smov 128   ;;  %s234_s22 = int_to_ptr.vmem [resolvable:$true] %s233_s22 }
  0x15   : > { %p821_p11 = pneg %p1217_p10  ;;  %s1121_s29 = smov 8  }
  0x16   : > { %s1122_s8 = smov [#allocation10]   ;;  %s217_s17 = sshll.u32 %s1359_s0, 4  ;;  %s218_s17 = int_to_ptr.hbm [resolvable:$true] %s217_s17 }
  0x17   : > { %p1231_p12 = pnand %p841_p9, %p821_p11  ;;  %s261_s9 = sshll.u32 %s1122_s8, 4  ;;  %s262_s9 = int_to_ptr.vmem [resolvable:$true] %s261_s9 }
  0x18   : > { %s231_s16 = sshll.u32 %s1373_s1, 4  ;;  %s245_s1 = sshll.u32 %s1361_s2, 4  ;;  %s232_s16 = int_to_ptr.hbm [resolvable:$true] %s231_s16  ;;  %s246_s1 = int_to_ptr.hbm [resolvable:$true] %s245_s1 }
  0x19   : > { %s259_s19 = sshll.u32 %s1374_s3, 4  ;;  %s1123_s3 = smov [#allocation4]   ;;  %s260_s19 = int_to_ptr.hbm [resolvable:$true] %s259_s19 }
  0x1a   : > { %827 = dma.hbm_to_vmem [thread:$0]  (!%p1231_p12), %s232_s16, 256, %s234_s22, [#allocation8], %s1120_s23, %s1120_s23, %s1121_s29  }
  0x1b   : > { %833 = dma.hbm_to_vmem [thread:$0]  (!%p1231_p12), %s260_s19, 2048, %s262_s9, [#allocation11], %s1120_s23, %s1120_s23, %s1121_s29  }
  0x1c   : > { %s219_s10 = sshll.u32 %s1123_s3, 4  ;;  %s1124_s16 = smov [#allocation9]   ;;  %s220_s10 = int_to_ptr.vmem [resolvable:$true] %s219_s10 }
  0x1d   : > { %824 = dma.hbm_to_vmem [thread:$0]  (!%p1231_p12), %s218_s17, 256, %s220_s10, [#allocation5], %s1120_s23, %s1120_s23, %s1121_s29  }
  0x1e   : > { %s247_s22 = sshll.u32 %s1124_s16, 4  ;;  %s273_s15 = sshll.u32 %s1363_s4, 4  ;;  %s248_s22 = int_to_ptr.vmem [resolvable:$true] %s247_s22  ;;  %s274_s15 = int_to_ptr.hbm [resolvable:$true] %s273_s15 }
  0x1f   : > { %830 = dma.hbm_to_vmem [thread:$0]  (!%p1231_p12), %s246_s1, 256, %s248_s22, [#allocation8], %s1120_s23, %s1120_s23, %s1121_s29  }
  0x20   : > { %s1125_s19 = smov [#allocation12]   ;;  %302 = sbr.rel (%p1217_p10) target bundleno = 400 (0x190), region = 48 }
  0x21   : > { %s275_s9 = sshll.u32 %s1125_s19, 4  ;;  %s276_s9 = int_to_ptr.vmem [resolvable:$true] %s275_s9 }
  0x22   : > { %836 = dma.hbm_to_vmem [thread:$0]  (!%p1231_p12), %s274_s15, 2048, %s276_s9, [#allocation11], %s1120_s23, %s1120_s23, %s1121_s29  }
  0x25   : > { %1088 = dma.done.wait (%p841_p9), [#allocation5], 256  }
  0x26   : > { %1090 = vsyncadd (%p841_p9), [#allocation5], 4294967040 }
  0x27   : > { %1092 = dma.done.wait (%p841_p9), [#allocation8], 512  }
  0x28   : > { %1094 = vsyncadd (%p841_p9), [#allocation8], 4294966784 }
  0x29   : > { %1096 = dma.done.wait (%p841_p9), [#allocation11], 4096  }
  0x2a   : > { %1098 = vsyncadd (%p841_p9), [#allocation11], 4294963200  ;;  %v470_v0 = vld [vmem:[#allocation12 + $0x78] sm:$0xff]  ;;  %v469_v1 = vld [vmem:[#allocation12 + $0x70] sm:$0xff]  ;;  %p355_p13 = scmp.lt.s32.totalorder %s1189_s28, 1  ;;  %vm514_vm0 = vcmask 130048  }
  0x2b   : > { %v382_v2 = vld [vmem:[%s1364_s5 + $0x78] sm:$0xff]  ;;  %471 = vmatpush.msra.mxu2 %v470_v0  ;;  %v423_v3 = vld [vmem:[#allocation10 + $0x78] sm:$0xff]  ;;  %v381_v4 = vld [vmem:[%s1364_s5 + $0x70] sm:$0xff]  ;;  %s352_s13 = sand.u32 1, %s1109_s25   ;;  %s1063_s9 = scalar_lea.hbm %s1366_s7, 64 }
  0x2c   : > { %383 = vmatpush.msra.mxu0 %v382_v2  ;;  %424 = vmatpush.msra.mxu1 %v423_v3  ;;  %v468_v5 = vld [vmem:[#allocation12 + $0x68] sm:$0xff]  ;;  %v422_v6 = vld [vmem:[#allocation10 + $0x70] sm:$0xff]  ;;  %v380_v7 = vld [vmem:[%s1364_s5 + $0x68] sm:$0xff]  ;;  %s356_s23 = scalar_select %p355_p13, %s1189_s28, 1 }
  0x2d   : > { %472 = vmatpush.msra.mxu2 %v469_v1  ;;  %v421_v8 = vld [vmem:[#allocation10 + $0x68] sm:$0xff]  ;;  %v467_v9 = vld [vmem:[#allocation12 + $0x60] sm:$0xff]  ;;  %v379_v10 = vld [vmem:[%s1364_s5 + $0x60] sm:$0xff]  ;;  %s771_s20 = sshll.u32 %s352_s13, 5 }
  0x2e   : > { %384 = vmatpush.msra.mxu0 %v381_v4  ;;  %425 = vmatpush.msra.mxu1 %v422_v6  ;;  %v420_v11 = vld [vmem:[#allocation10 + $0x60] sm:$0xff]  ;;  %v466_v12 = vld [vmem:[#allocation12 + $0x58] sm:$0xff]  ;;  %v378_v13 = vld [vmem:[%s1364_s5 + $0x58] sm:$0xff]  ;;  %s797_s16 = sshll.u32 %s356_s23, 5  ;;  %s798_s23 = sshll.u32 %s1189_s28, 5 }
  0x2f   : > { %473 = vmatpush.msra.mxu2 %v468_v5  ;;  %v419_v14 = vld [vmem:[#allocation10 + $0x58] sm:$0xff]  ;;  %v465_v15 = vld [vmem:[#allocation12 + $0x50] sm:$0xff]  ;;  %v377_v16 = vld [vmem:[%s1364_s5 + $0x50] sm:$0xff]  ;;  %s359_s19 = scalar_lea.vmem %s1365_s6, %s797_s16  ;;  %s354_s29 = scalar_lea.vmem [#allocation13], %s771_s20 }
  0x30   : > { %385 = vmatpush.msra.mxu0 %v380_v7  ;;  %426 = vmatpush.msra.mxu1 %v421_v8  ;;  %v418_v17 = vld [vmem:[#allocation10 + $0x50] sm:$0xff]  ;;  %v464_v18 = vld [vmem:[#allocation12 + $0x48] sm:$0xff]  ;;  %v376_v19 = vld [vmem:[%s1364_s5 + $0x48] sm:$0xff]  ;;  %s641_s21 = scalar_lea.hbm %s1366_s7, %s798_s23  ;;  %s642_s16 = sshll.u32 %s354_s29, 4  ;;  %s643_s16 = int_to_ptr.vmem [resolvable:$true] %s642_s16 }
  0x31   : > { %474 = vmatpush.msra.mxu2 %v467_v9  ;;  %v417_v20 = vld [vmem:[#allocation10 + $0x48] sm:$0xff]  ;;  %v463_v21 = vld [vmem:[#allocation12 + $0x40] sm:$0xff]  ;;  %v375_v22 = vld [vmem:[%s1364_s5 + $0x40] sm:$0xff]  ;;  %s644_s22 = sshll.u32 %s641_s21, 4  ;;  %s630_s28 = scalar_lea.sflag [#allocation6], %s352_s13  ;;  %s645_s22 = int_to_ptr.hbm [resolvable:$true] %s644_s22 }
  0x32   : > { %386 = vmatpush.msra.mxu0 %v379_v10  ;;  %427 = vmatpush.msra.mxu1 %v420_v11  ;;  %v416_v23 = vld [vmem:[#allocation10 + $0x40] sm:$0xff]  ;;  %v462_v24 = vld [vmem:[#allocation12 + $0x38] sm:$0xff]  ;;  %v374_v25 = vld [vmem:[%s1364_s5 + $0x38] sm:$0xff]  ;;  %s1057_s8 = sshra.s32 %s645_s22, 4  ;;  %s1058_s8 = int_to_ptr.hbm [resolvable:$true] %s1057_s8 }
  0x33   : > { %475 = vmatpush.msra.mxu2 %v466_v12  ;;  %v415_v26 = vld [vmem:[#allocation10 + $0x38] sm:$0xff]  ;;  %v461_v27 = vld [vmem:[#allocation12 + $0x30] sm:$0xff]  ;;  %v373_v28 = vld [vmem:[%s1364_s5 + $0x30] sm:$0xff]  ;;  %s1059_s14 = scalar_lea.hbm %s1058_s8, 32  ;;  %p1064_p3 = scmp.lt.s32.totalorder %s1058_s8, %s1366_s7 }
  0x34   : > { %387 = vmatpush.msra.mxu0 %v378_v13  ;;  %428 = vmatpush.msra.mxu1 %v419_v14  ;;  %v414_v29 = vld [vmem:[#allocation10 + $0x30] sm:$0xff]  ;;  %v460_v30 = vld [vmem:[#allocation12 + $0x28] sm:$0xff]  ;;  %v372_v31 = vld [vmem:[%s1364_s5 + $0x28] sm:$0xff]  ;;  %p1060_p0 = scmp.ne.s32.totalorder %s1058_s8, %s1059_s14  ;;  %p1065_p4 = scmp.lt.s32.totalorder %s1063_s9, %s1059_s14 }
  0x35   : > { %476 = vmatpush.msra.mxu2 %v465_v15  ;;  %v413_v32 = vld [vmem:[#allocation10 + $0x28] sm:$0xff]  ;;  %v459_v33 = vld [vmem:[#allocation12 + $0x20] sm:$0xff]  ;;  %v371_v34 = vld [vmem:[%s1364_s5 + $0x20] sm:$0xff] }
  0x36   : > { %388 = vmatpush.msra.mxu0 %v377_v16  ;;  %429 = vmatpush.msra.mxu1 %v418_v17  ;;  %v412_v35 = vld [vmem:[#allocation10 + $0x20] sm:$0xff]  ;;  %v458_v36 = vld [vmem:[#allocation12 + $0x18] sm:$0xff]  ;;  %v370_v37 = vld [vmem:[%s1364_s5 + $0x18] sm:$0xff]  ;;  %p1061_p1 = pnand %p1060_p0, %p1206_p5  ;;  %p1066_p7 = por %p1065_p4, %p1064_p3 }
  0x37   : > { %477 = vmatpush.msra.mxu2 %v464_v18  ;;  %v411_v38 = vld [vmem:[#allocation10 + $0x18] sm:$0xff]  ;;  %v457_v39 = vld [vmem:[#allocation12 + $0x10] sm:$0xff]  ;;  %v369_v40 = vld [vmem:[%s1364_s5 + $0x10] sm:$0xff] }
  0x38   : > { %389 = vmatpush.msra.mxu0 %v376_v19  ;;  %430 = vmatpush.msra.mxu1 %v417_v20  ;;  %v410_v41 = vld [vmem:[#allocation10 + $0x10] sm:$0xff]  ;;  %v456_v42 = vld [vmem:[#allocation12 + $0x8] sm:$0xff]  ;;  %v368_v43 = vld [vmem:[%s1364_s5 + $0x8] sm:$0xff]  ;;  %p1062_p2 = pneg %p1061_p1 }
  0x39   : > { %478 = vmatpush.msra.mxu2 %v463_v21  ;;  %v360_v44 = vld [vmem:[%s359_s19] sm:$0xff]  ;;  %v409_v45 = vld [vmem:[#allocation10 + $0x8] sm:$0xff]  ;;  %v455_v46 = vld [vmem:[#allocation12] sm:$0xff] }
  0x3a   : > { %390 = vmatpush.msra.mxu0 %v375_v22  ;;  %431 = vmatpush.msra.mxu1 %v416_v23  ;;  %v774_v47 = vld [vmem:[%s359_s19 + $0x10] sm:$0xff]  ;;  %v367_v48 = vld [vmem:[%s1364_s5] sm:$0xff]  ;;  %v361_v51 = vld [vmem:[%s359_s19 + $0x8] sm:$0xff]  ;;  %p1067_p8 = pnand %p1066_p7, %p1062_p2 }
  0x3b   : > { %479 = vmatpush.msra.mxu2 %v462_v24  ;;  %v408_v49 = vld [vmem:[#allocation10] sm:$0xff]  ;;  %v365_v50 = vadd.f32 %v774_v47, %v360_v44  ;;  %v775_v52 = vld [vmem:[%s359_s19 + $0x18] sm:$0xff]  ;;  %v510_v4 = vld [vmem:[#allocation9] sm:$0xff] }
  0x3c   : > { %391 = vmatpush.msra.mxu0 %v374_v25  ;;  %432 = vmatpush.msra.mxu1 %v415_v26  ;;  %v366_v53 = vadd.f32 %v775_v52, %v361_v51  ;;  %v511_v5 = vld [vmem:[#allocation9 + $0x8] sm:$0xff]  ;;  %v547_v6 = vld [vmem:[#allocation4] sm:$0xff]  ;;  %v586_v8 = vld [vmem:[#allocation7] sm:$0xff] }
  0x3d   : > { %480 = vmatpush.msra.mxu2 %v461_v27  ;;  %v548_v7 = vld [vmem:[#allocation4 + $0x8] sm:$0xff]  ;;  %v587_v9 = vld [vmem:[#allocation7 + $0x8] sm:$0xff] }
  0x3e   : > { %392 = vmatpush.msra.mxu0 %v373_v28  ;;  %433 = vmatpush.msra.mxu1 %v414_v29 }
  0x3f   : > { %481 = vmatpush.msra.mxu2 %v460_v30 }
  0x40   : > { %393 = vmatpush.msra.mxu0 %v372_v31  ;;  %434 = vmatpush.msra.mxu1 %v413_v32 }
  0x41   : > { %482 = vmatpush.msra.mxu2 %v459_v33 }
  0x42   : > { %394 = vmatpush.msra.mxu0 %v371_v34  ;;  %435 = vmatpush.msra.mxu1 %v412_v35 }
  0x43   : > { %483 = vmatpush.msra.mxu2 %v458_v36 }
  0x44   : > { %395 = vmatpush.msra.mxu0 %v370_v37  ;;  %436 = vmatpush.msra.mxu1 %v411_v38 }
  0x45   : > { %484 = vmatpush.msra.mxu2 %v457_v39 }
  0x46   : > { %396 = vmatpush.msra.mxu0 %v369_v40  ;;  %437 = vmatpush.msra.mxu1 %v410_v41 }
  0x47   : > { %485 = vmatpush.msra.mxu2 %v456_v42 }
  0x48   : > { %397 = vmatpush.msra.mxu0 %v368_v43  ;;  %438 = vmatpush.msra.mxu1 %v409_v45 }
  0x49   : > { %486 = vmatpush.msra.mxu2 %v455_v46 }
  0x4a   : > { %398 = vmatpush.msra.mxu0 %v367_v48  ;;  %487 = vmatmul.f32.vlgmr.msra.gmra.mxu2 %v774_v47 }
  0x4b   : > { %439 = vmatpush.msra.mxu1 %v408_v49  ;;  %399 = vmatmul.f32.vlgmr.msra.gmra.mxu0 %v365_v50 }
  0x4c   : > { %440 = vmatmul.f32.vlgmr.msra.gmra.mxu1 %v360_v44 }
  0x52   : > { %490 = vmatmul.f32.gmra.mxu2 %v775_v52 }
  0x53   : > { %402 = vmatmul.f32.gmra.mxu0 %v366_v53 }
  0x54   : > { %443 = vmatmul.f32.gmra.mxu1 %v361_v51 }
  0xc8   : > { %v400_v54 = vpop.f32.mrf.mxu0 }
  0xc9   : > { %v441_v55 = vpop.f32.mrf.mxu1 }
  0xca   : > { %v451_v59 = vsub.f32 %v400_v54, %v441_v55 }
  0xcd   : > { %v488_v56 = vpop.f32.mrf.mxu2 }
  0xce   : > { %v496_v62 = vsub.f32 %v441_v55, %v488_v56  ;;  %v502_v63 = vsub.f32 %v451_v59, %v488_v56 }
  0xd0   : > { %v403_v57 = vpop.f32.mrf.mxu0  ;;  %v512_v3 = vadd.f32 %v502_v63, %v496_v62 }
  0xd1   : > { %v444_v58 = vpop.f32.mrf.mxu1 }
  0xd2   : > { %v452_v60 = vsub.f32 %v403_v57, %v444_v58 }
  0xd5   : > { %v491_v61 = vpop.f32.mrf.mxu2 }
  0xd6   : > { %v497_v0 = vsub.f32 %v444_v58, %v491_v61  ;;  %v503_v1 = vsub.f32 %v452_v60, %v491_v61 }
  0xd8   : > { %v513_v2 = vadd.f32 %v503_v1, %v497_v0 }
  0xda   : > { %535 = vmatpush.msra.mxu3 %v513_v2 }
  0xdc   : > { %536 = vmatpush.msra.mxu3 %v512_v3 }
  0xdd   : > { %776 = vmatmul.msk.f32.vlgmr.msra.gmra.mxu3 %vm514_vm0, %v510_v4 }
  0xde   : > { %569 = vmatpush.msrb.mxu3 %v497_v0 }
  0xe0   : > { %570 = vmatpush.msrb.mxu3 %v496_v62 }
  0xe2   : > { %608 = vmatpush.msra.mxu3 %v503_v1 }
  0xe4   : > { %609 = vmatpush.msra.mxu3 %v502_v63 }
  0xe5   : > { %777 = vmatmul.msk.f32.gmra.mxu3 %vm514_vm0, %v511_v5 }
  0xed   : > { %780 = vmatmul.msk.f32.vlgmr.msrb.gmra.mxu3 %vm514_vm0, %v547_v6 }
  0xf5   : > { %781 = vmatmul.msk.f32.gmra.mxu3 %vm514_vm0, %v548_v7 }
  0xfd   : > { %786 = vmatmul.msk.f32.vlgmr.msra.gmra.mxu3 %vm514_vm0, %v586_v8 }
 0x105   : > { %787 = vmatmul.msk.f32.gmra.mxu3 %vm514_vm0, %v587_v9 }
 0x160   : > { %v538_v10 = vpop.f32.mrf.mxu3 }
 0x168   : > { %v541_v11 = vpop.f32.mrf.mxu3 }
 0x170   : > { %v572_v12 = vpop.f32.mrf.mxu3 }
 0x171   : > { %v582_v14 = vsub.f32 %v538_v10, %v572_v12 }
 0x178   : > { %v575_v13 = vpop.f32.mrf.mxu3 }
 0x179   : > { %v583_v18 = vsub.f32 %v541_v11, %v575_v13 }
 0x180   : > { %v611_v15 = vpop.f32.mrf.mxu3 }
 0x181   : > { %v619_v16 = vsub.f32 %v572_v12, %v611_v15  ;;  %v625_v17 = vsub.f32 %v582_v14, %v611_v15 }
 0x183   : > { %621 = vst [vmem:[%s354_s29] sm:$0xff] %v619_v16 }
 0x184   : > { %790 = vst [vmem:[%s354_s29 + $0x10] sm:$0xff] %v625_v17 }
 0x188   : > { %v614_v19 = vpop.f32.mrf.mxu3 }
 0x189   : > { %v620_v20 = vsub.f32 %v575_v13, %v614_v19  ;;  %v626_v21 = vsub.f32 %v583_v18, %v614_v19 }
 0x18b   : > { %622 = vst [vmem:[%s354_s29 + $0x8] sm:$0xff] %v620_v20 }
 0x18c   : > { %791 = vst [vmem:[%s354_s29 + $0x18] sm:$0xff] %v626_v21 }
 0x18d   : > { %1070 = shalt.err (!%p1067_p8)
}
 0x18e   : > { %s1126_s10 = smov 128   ;;  %s1127_s13 = smov 8  }
 0x18f   : > { %819 = dma.vmem_to_hbm [thread:$0]  (%p1206_p5), %s643_s16, 512, %s645_s22, %s630_s28, %s1126_s10, %s1126_s10, %s1127_s13  }
 0x190 PF: > { %p851_p9 = scmp.ge.s32.totalorder %s1117_s27, 2  ;;  %s659_s20 = sand.u32 1, %s1105_s24  }
 0x191   : > { %s660_s23 = scalar_lea.sflag [#allocation6], %s659_s20 }
 0x192   : > { %p838_p10 = pnand %p851_p9, %p1210_p6 }
 0x194   : > { %p839_p11 = pneg %p838_p10 }
 0x196   : > { %1100 = dma.done.wait (%p839_p11), %s660_s23, 512  }
 0x197   : > { %1102 = vsyncadd (%p839_p11), %s660_s23, 4294966784  ;;  %s1376_s29 = sld [smem:[#allocation18_spill]]  ;;  %p20_p12 = scmp.ge.s32.totalorder %s1193_s30, 4  }
 0x198   : > { %s1377_s24 = smov %s1109_s25  ;;  %s1378_s25 = smov %s1113_s26 }
 0x199   : > { %s1380_s27 = smov %s1193_s30  ;;  %22 = sbr.rel (!%p20_p12) target bundleno = 9 (0x9), region = 106 }
 0x19d   : > { %s1379_s26 = smov %s1376_s29 }
 0x19e   :  { %666 = vsyncpa [#allocation5], 1 }
 0x19f   :  { %668 = vsyncpa [#allocation5 + $0x1], 1 }
 0x1a0   :  { %669 = vsyncpa [#allocation8], 1 }
 0x1a1   :  { %670 = vsyncpa [#allocation11], 1 }
 0x1a2   :  { %671 = vsyncpa [#allocation6], 1 }
 0x1a3   :  { %673 = vsyncpa [#allocation6 + $0x1], 1 }

</bundles_post_ra>
